<compile_context>
chip_gen: v6e
topology: v6e:2x2x1
jax: 0.10.0
libtpu: 0.0.40
codegen_flags: <defaults>
</compile_context>

<pallas_src>
import functools
import math

import jax
import jax.numpy as jnp
from jax import lax
from jax.experimental import pallas as pl
from jax.experimental.pallas import tpu as pltpu


# --------------------------------------------------------------------------- #
# Tiling / planning helpers
# --------------------------------------------------------------------------- #
def _tile_and_pad(dim, target, align):
    """Pick (tile, padded_dim).  A full-dim block is always legal, so small
    dims are left untouched; otherwise the tile is a multiple of `align` and
    the dim is padded up to a multiple of the tile."""
    if dim <= max(target, align):
        return dim, dim
    nt = math.ceil(dim / target)
    tile = math.ceil(math.ceil(dim / nt) / align) * align
    return tile, nt * tile


def _plan_tiles(B, H, N, mxu_itemsize, tb_target, tn_target, vmem_budget):
    """Choose (TB, Bp, TN, Np, vmem_footprint) under a VMEM budget.
    Shrinks the negatives tile first, then the batch tile."""
    tb_t, tn_t = tb_target, tn_target
    while True:
        TB, Bp = _tile_and_pad(B, tb_t, 8)       # sublane-aligned batch tile
        TN, Np = _tile_and_pad(N, tn_t, 128)     # lane-aligned negatives tile
        fp = (2 * H * H * 4                      # W (double-buffered, f32)
              + 2 * H * TN * mxu_itemsize        # negatives tile (dbl-buffered)
              + 2 * 2 * TB * H * 4               # lhs + positives tiles (f32)
              + 2 * TB * 4                       # output tile
              + TB * H * mxu_itemsize            # qw scratch
              + 4 * TB * 4)                      # pos / m / s scratch
        if fp <= vmem_budget:
            return TB, Bp, TN, Np, fp
        if tn_t > 256 and TN > 256:
            tn_t = max(256, tn_t // 2)
        elif tb_t > 64 and TB > 64:
            tb_t = max(64, tb_t // 2)
        else:
            return TB, Bp, TN, Np, fp


def _supports_bf16_eup():
    """v6e / v7x have a bf16-capable EUP/VPU; v5e and older do not."""
    try:
        kind = jax.devices()[0].device_kind.lower()
    except Exception:
        return False
    return ("v6" in kind) or ("v7" in kind) or ("7x" in kind)


# --------------------------------------------------------------------------- #
# Kernel
# --------------------------------------------------------------------------- #
def _build_kernel(tn, n_valid, n_padded, eup_bf16):
    needs_mask = (n_padded != n_valid)

    def kernel(temp_ref, lhs_ref, pos_ref, negt_ref, w_ref, out_ref,
               qw_sc, pos_sc, m_sc, s_sc):
        k = pl.program_id(2)
        nk = pl.num_programs(2)
        inv_t = 1.0 / temp_ref[0]

        @pl.when(k == 0)
        def _init():
            # Projection matmul (f32) once per (direction, B-tile); the f32 qw
            # feeds the positive logit, then is cached (possibly bf16) for the
            # per-N-tile negatives matmul.
            qw = jnp.dot(lhs_ref[0], w_ref[...],
                         preferred_element_type=jnp.float32)
            pos = jnp.sum(qw * pos_ref[0], axis=1, keepdims=True)
            pos_logit = jnp.tanh(pos) * inv_t                 # (TB, 1)
            qw_sc[...] = qw.astype(qw_sc.dtype)
            pos_sc[...] = pos_logit
            m_sc[...] = pos_logit                             # running-max seed
            s_sc[...] = jnp.ones(s_sc.shape, jnp.float32)     # exp(pos-pos) == 1

        # Negative logits for this N tile: negatives arrive pre-transposed, so
        # this is a plain (TB,H)@(H,TN) with no in-loop XLU transpose; bf16
        # operands -> native MXU rate, f32 accumulate.
        negl = jnp.dot(qw_sc[...], negt_ref[0],
                       preferred_element_type=jnp.float32)
        if eup_bf16:
            # bf16 tanh on the EUP (~2x throughput on v6e / v7x).
            negl = jnp.tanh(negl.astype(jnp.bfloat16)).astype(jnp.float32) * inv_t
        else:
            negl = jnp.tanh(negl) * inv_t

        if needs_mask:
            # Padded negative columns must not contribute to the denominator.
            col = k * tn + lax.broadcasted_iota(jnp.int32, negl.shape, 1)
            negl = jnp.where(col < n_valid, negl, -1e30)

        # Online logsumexp update (flash-attention style).
        # TODO(synk): since |tanh| <= 1 all logits are bounded by 1/temp, a
        # fixed shift could replace the running max for moderate temp values.
        m_prev = m_sc[...]
        m_new = jnp.maximum(m_prev, jnp.max(negl, axis=1, keepdims=True))
        shifted = negl - m_new
        if eup_bf16:
            p = jnp.exp(shifted.astype(jnp.bfloat16)).astype(jnp.float32)
        else:
            p = jnp.exp(shifted)
        s_sc[...] = (s_sc[...] * jnp.exp(m_prev - m_new)
                     + jnp.sum(p, axis=1, keepdims=True))
        m_sc[...] = m_new

        @pl.when(k == nk - 1)
        def _finalize():
            # per-row loss = logsumexp(all logits) - positive_logit
            out_ref[0] = (jnp.log(s_sc[...]) + m_sc[...]
                          - pos_sc[...]).astype(out_ref.dtype)

    return kernel


# --------------------------------------------------------------------------- #
# pallas_call wrapper
# --------------------------------------------------------------------------- #
def _infonce_row_losses(temp, weight, lhs, negt, pos=None, *,
                        mxu_dtype=jnp.bfloat16, eup_bf16=False,
                        tb_target=1024, tn_target=1024,
                        vmem_budget=40 * 1024 * 1024):
    """lhs (and optional pos): (D, B, H); negt: (D, H, N) (pre-transposed).
    Returns per-row losses (D, B, 1).  If pos is None, D must be 2 and the
    positives of direction d are read from lhs[1-d] (no extra HBM buffer)."""
    D, B, H = lhs.shape
    N = negt.shape[-1]

    # HBM-side cast of the dominant stream to the MXU operand dtype.
    negt = negt.astype(mxu_dtype)
    mxu_itemsize = negt.dtype.itemsize

    TB, Bp, TN, Np, footprint = _plan_tiles(
        B, H, N, mxu_itemsize, tb_target, tn_target, vmem_budget)

    if Bp != B:
        lhs = jnp.pad(lhs, ((0, 0), (0, Bp - B), (0, 0)))
        if pos is not None:
            pos = jnp.pad(pos, ((0, 0), (0, Bp - B), (0, 0)))
    if Np != N:
        negt = jnp.pad(negt, ((0, 0), (0, 0), (0, Np - N)))

    nb, nk = Bp // TB, Np // TN

    if pos is None:
        assert D == 2, "shared-positive layout needs both directions stacked"
        pos_arr = lhs
        pos_map = lambda d, i, k: (1 - d, i, 0)   # positives = other direction
    else:
        pos_arr = pos
        pos_map = lambda d, i, k: (d, i, 0)

    flops = 2 * D * Bp * H * (H + Np + 1)
    transcendentals = D * Bp * (2 * Np + 3)
    bytes_accessed = (2 * D * Bp * H * lhs.dtype.itemsize       # lhs + positives
                      + nb * D * H * Np * negt.dtype.itemsize   # negt per B-tile
                      + H * H * weight.dtype.itemsize           # resident W
                      + D * Bp * 4)                             # per-row losses

    out = pl.pallas_call(
        _build_kernel(TN, N, Np, eup_bf16),
        out_shape=jax.ShapeDtypeStruct((D, Bp, 1), jnp.float32),
        grid=(D, nb, nk),
        in_specs=[
            pl.BlockSpec(memory_space=pltpu.MemorySpace.SMEM),    # temp (1,)
            pl.BlockSpec((1, TB, H), lambda d, i, k: (d, i, 0)),  # lhs
            pl.BlockSpec((1, TB, H), pos_map),                    # positives
            # TODO(synk): sweep pipeline_mode=pl.Buffered(3) on this stream if
            # the H*TN DMA becomes exposed with the faster bf16 compute.
            pl.BlockSpec((1, H, TN), lambda d, i, k: (d, 0, k)),  # neg^T
            pl.BlockSpec((H, H), lambda d, i, k: (0, 0)),         # W resident
        ],
        out_specs=pl.BlockSpec((1, TB, 1), lambda d, i, k: (d, i, 0)),
        scratch_shapes=[
            pltpu.VMEM((TB, H), mxu_dtype),     # cached q @ W (MXU operand dtype)
            pltpu.VMEM((TB, 1), jnp.float32),   # positive logit
            pltpu.VMEM((TB, 1), jnp.float32),   # running max
            pltpu.VMEM((TB, 1), jnp.float32),   # running sum
        ],
        compiler_params=pltpu.CompilerParams(
            dimension_semantics=("parallel", "parallel", "arbitrary"),
            vmem_limit_bytes=int(max(footprint + (8 << 20), 16 << 20)),
        ),
        cost_estimate=pl.CostEstimate(
            flops=flops,
            transcendentals=transcendentals,
            bytes_accessed=bytes_accessed),
    )(temp, lhs, pos_arr, negt, weight)

    return out[:, :B] if Bp != B else out


@functools.partial(jax.jit, static_argnames=("mxu_dtype", "use_bf16_eup"))
def infonce_forward(temp, weight, query, click_item, neg_item, neg_query,
                    *, mxu_dtype=jnp.bfloat16, use_bf16_eup=None):
    # TODO(synk): forward-only; training would need a custom_vjp with Pallas
    # backward kernels (jax.grad through this pallas_call is not provided).
    if use_bf16_eup is None:
        use_bf16_eup = (mxu_dtype == jnp.bfloat16) and _supports_bf16_eup()

    if neg_item.shape == neg_query.shape:
        # Fused path: both directions share one launch and one resident W;
        # positives are read from the other direction's slice of `lhs`.
        lhs = jnp.stack([query, click_item])                        # (2, B, H)
        negt = jnp.stack([jnp.swapaxes(neg_item, 0, 1),
                          jnp.swapaxes(neg_query, 0, 1)])           # (2, H, N)
        losses = _infonce_row_losses(temp, weight, lhs, negt,
                                     mxu_dtype=mxu_dtype,
                                     eup_bf16=use_bf16_eup)
        return 0.5 * (jnp.mean(losses[0]) + jnp.mean(losses[1]))

    # Fallback when the two negative pools differ in size: two calls.
    l_q = _infonce_row_losses(temp, weight, query[None],
                              jnp.swapaxes(neg_item, 0, 1)[None],
                              pos=click_item[None],
                              mxu_dtype=mxu_dtype, eup_bf16=use_bf16_eup)
    l_i = _infonce_row_losses(temp, weight, click_item[None],
                              jnp.swapaxes(neg_query, 0, 1)[None],
                              pos=query[None],
                              mxu_dtype=mxu_dtype, eup_bf16=use_bf16_eup)
    return 0.5 * (jnp.mean(l_q) + jnp.mean(l_i))


# ----- pure-JAX reference (mirrors the PyTorch module) ---------------------- #
def _ref_direction_loss(temp, weight, query, item, neg_item):
    qw = query @ weight
    pos = jnp.sum(qw * item, axis=1, keepdims=True)
    neg = qw @ neg_item.T
    logits = jnp.concatenate([jnp.tanh(pos), jnp.tanh(neg)], axis=1) / temp
    lse = jax.scipy.special.logsumexp(logits, axis=1)
    return jnp.mean(lse - logits[:, 0])


def _ref_forward(temp, weight, query, click_item, neg_item, neg_query):
    return 0.5 * (_ref_direction_loss(temp, weight, query, click_item, neg_item)
                  + _ref_direction_loss(temp, weight, click_item, query, neg_query))


if __name__ == "__main__":
    B, H, N = 8, 32, 16
    temp_init = 0.1

    key = jax.random.PRNGKey(0)
    k_w, k_q, k_c, k_ni, k_nq = jax.random.split(key, 5)

    # Deterministic parameter init (xavier_normal_ for the square weight:
    # std = sqrt(2 / (fan_in + fan_out)) = sqrt(1 / H)).
    weight = jax.random.normal(k_w, (H, H), jnp.float32) * jnp.sqrt(1.0 / H)
    temp = jnp.array([temp_init], jnp.float32)

    query = jax.random.normal(k_q, (B, H), jnp.float32)
    click_item = jax.random.normal(k_c, (B, H), jnp.float32)
    neg_item = jax.random.normal(k_ni, (N, H), jnp.float32)
    neg_query = jax.random.normal(k_nq, (N, H), jnp.float32)

    ref = _ref_forward(temp[0], weight, query, click_item, neg_item, neg_query)

    # Precise path (f32 MXU operands, f32 transcendentals): tight check.
    out_f32 = infonce_forward(temp, weight, query, click_item, neg_item,
                              neg_query, mxu_dtype=jnp.float32,
                              use_bf16_eup=False)
    out_f32 = jax.block_until_ready(out_f32)
    assert jnp.allclose(out_f32, ref, rtol=1e-5, atol=1e-5), (out_f32, ref)

    # Fast default path (bf16 MXU operands; bf16 tanh/exp on v6e/v7x):
    # looser tolerance due to reduced-precision compute.
    out_fast = infonce_forward(temp, weight, query, click_item, neg_item,
                               neg_query)
    out_fast = jax.block_until_ready(out_fast)
    assert jnp.allclose(out_fast, ref, rtol=5e-2, atol=1e-1), (out_fast, ref)

    print("KERNEL_OK")
</pallas_src>

<mosaic_0001>
module attributes {stable_mosaic.version = 11 : i64} {
  func.func @kernel(%arg0: i32, %arg1: i32, %arg2: i32, %arg3: memref<1xf32, #tpu.memory_space<smem>>, %arg4: memref<1x8x32xf32, #tpu.memory_space<vmem>>, %arg5: memref<1x8x32xf32, #tpu.memory_space<vmem>>, %arg6: memref<1x32x16xf32, #tpu.memory_space<vmem>>, %arg7: memref<32x32xf32, #tpu.memory_space<vmem>>, %arg8: memref<1x8x1xf32, #tpu.memory_space<vmem>>, %arg9: memref<8x32xf32, #tpu.memory_space<vmem>>, %arg10: memref<8x1xf32, #tpu.memory_space<vmem>>, %arg11: memref<8x1xf32, #tpu.memory_space<vmem>>, %arg12: memref<8x1xf32, #tpu.memory_space<vmem>>) attributes {dimension_semantics = [#tpu.dimension_semantics<parallel>, #tpu.dimension_semantics<parallel>, #tpu.dimension_semantics<arbitrary>], iteration_bounds = array<i64: 2, 1, 1>, scalar_prefetch = 0 : i64, scratch_operands = 4 : i64, tpu.core_type = #tpu.core_type<tc>, window_params = [{transform_indices = @transform_0, window_bounds = array<i64: 1>}, {transform_indices = @transform_1, window_bounds = array<i64: 1, 8, 32>}, {transform_indices = @transform_2, window_bounds = array<i64: 1, 8, 32>}, {transform_indices = @transform_3, window_bounds = array<i64: 1, 32, 16>}, {pipeline_mode = #tpu.pipeline_mode<synchronous>, transform_indices = @transform_4, window_bounds = array<i64: 32, 32>}, {transform_indices = @transform_5, window_bounds = array<i64: 1, 8, 1>}]} {
    %c0 = arith.constant 0 : index
    %0 = memref.load %arg3[%c0] : memref<1xf32, #tpu.memory_space<smem>>
    %cst = arith.constant 1.000000e+00 : f32
    %1 = arith.divf %cst, %0 : f32
    %c0_i32 = arith.constant 0 : i32
    %2 = arith.cmpi eq, %arg2, %c0_i32 : i32
    %3 = arith.extui %2 : i1 to i32
    %c0_i32_0 = arith.constant 0 : i32
    %4 = arith.cmpi ne, %3, %c0_i32_0 : i32
    scf.if %4 {
      %c0_19 = arith.constant 0 : index
      %c0_20 = arith.constant 0 : index
      %c0_21 = arith.constant 0 : index
      %31 = vector.load %arg4[%c0_19, %c0_20, %c0_21] : memref<1x8x32xf32, #tpu.memory_space<vmem>>, vector<1x8x32xf32>
      %32 = vector.shape_cast %31 : vector<1x8x32xf32> to vector<8x32xf32>
      %c0_22 = arith.constant 0 : index
      %c0_23 = arith.constant 0 : index
      %33 = vector.load %arg7[%c0_22, %c0_23] : memref<32x32xf32, #tpu.memory_space<vmem>>, vector<32x32xf32>
      %cst_24 = arith.constant dense<0.000000e+00> : vector<8x32xf32>
      %34 = tpu.matmul %32, %33, %cst_24 {dimension_numbers = #tpu.dot_dimension_numbers<[1], [0], [0], [1], [0, 0, 1, 1], [], []>} : vector<8x32xf32>, vector<32x32xf32>, vector<8x32xf32> -> vector<8x32xf32>
      %c0_25 = arith.constant 0 : index
      %c0_26 = arith.constant 0 : index
      %c0_27 = arith.constant 0 : index
      %35 = vector.load %arg5[%c0_25, %c0_26, %c0_27] : memref<1x8x32xf32, #tpu.memory_space<vmem>>, vector<1x8x32xf32>
      %36 = vector.shape_cast %35 : vector<1x8x32xf32> to vector<8x32xf32>
      %37 = arith.mulf %34, %36 : vector<8x32xf32>
      %cst_28 = arith.constant dense<0.000000e+00> : vector<8xf32>
      %38 = vector.multi_reduction <add>, %37, %cst_28 [1] : vector<8x32xf32> to vector<8xf32>
      %39 = vector.shape_cast %38 : vector<8xf32> to vector<8x1xf32>
      %40 = math.tanh %39 : vector<8x1xf32>
      %41 = vector.broadcast %1 : f32 to vector<8x1xf32>
      %42 = arith.mulf %40, %41 : vector<8x1xf32>
      %c0_29 = arith.constant 0 : index
      %c0_30 = arith.constant 0 : index
      %43 = vector.load %arg9[%c0_29, %c0_30] : memref<8x32xf32, #tpu.memory_space<vmem>>, vector<8x32xf32>
      tpu.vector_store %arg9[%c0_29, %c0_30], %34 {strides = array<i32>} : memref<8x32xf32, #tpu.memory_space<vmem>>, vector<8x32xf32>,
      %c0_31 = arith.constant 0 : index
      %c0_32 = arith.constant 0 : index
      %44 = vector.load %arg10[%c0_31, %c0_32] : memref<8x1xf32, #tpu.memory_space<vmem>>, vector<8x1xf32>
      tpu.vector_store %arg10[%c0_31, %c0_32], %42 {strides = array<i32>} : memref<8x1xf32, #tpu.memory_space<vmem>>, vector<8x1xf32>,
      %c0_33 = arith.constant 0 : index
      %c0_34 = arith.constant 0 : index
      %45 = vector.load %arg11[%c0_33, %c0_34] : memref<8x1xf32, #tpu.memory_space<vmem>>, vector<8x1xf32>
      tpu.vector_store %arg11[%c0_33, %c0_34], %42 {strides = array<i32>} : memref<8x1xf32, #tpu.memory_space<vmem>>, vector<8x1xf32>,
      %cst_35 = arith.constant 1.000000e+00 : f32
      %46 = vector.broadcast %cst_35 : f32 to vector<8x1xf32>
      %c0_36 = arith.constant 0 : index
      %c0_37 = arith.constant 0 : index
      %47 = vector.load %arg12[%c0_36, %c0_37] : memref<8x1xf32, #tpu.memory_space<vmem>>, vector<8x1xf32>
      tpu.vector_store %arg12[%c0_36, %c0_37], %46 {strides = array<i32>} : memref<8x1xf32, #tpu.memory_space<vmem>>, vector<8x1xf32>,
    } else {
    }
    %c0_1 = arith.constant 0 : index
    %c0_2 = arith.constant 0 : index
    %5 = vector.load %arg9[%c0_1, %c0_2] : memref<8x32xf32, #tpu.memory_space<vmem>>, vector<8x32xf32>
    %c0_3 = arith.constant 0 : index
    %c0_4 = arith.constant 0 : index
    %c0_5 = arith.constant 0 : index
    %6 = vector.load %arg6[%c0_3, %c0_4, %c0_5] : memref<1x32x16xf32, #tpu.memory_space<vmem>>, vector<1x32x16xf32>
    %7 = vector.shape_cast %6 : vector<1x32x16xf32> to vector<32x16xf32>
    %cst_6 = arith.constant dense<0.000000e+00> : vector<8x16xf32>
    %8 = tpu.matmul %5, %7, %cst_6 {dimension_numbers = #tpu.dot_dimension_numbers<[1], [0], [0], [1], [0, 0, 1, 1], [], []>} : vector<8x32xf32>, vector<32x16xf32>, vector<8x16xf32> -> vector<8x16xf32>
    %9 = math.tanh %8 : vector<8x16xf32>
    %10 = vector.broadcast %1 : f32 to vector<8x16xf32>
    %11 = arith.mulf %9, %10 : vector<8x16xf32>
    %c0_7 = arith.constant 0 : index
    %c0_8 = arith.constant 0 : index
    %12 = vector.load %arg11[%c0_7, %c0_8] : memref<8x1xf32, #tpu.memory_space<vmem>>, vector<8x1xf32>
    %cst_9 = arith.constant dense<0xFF800000> : vector<8xf32>
    %13 = vector.multi_reduction <maximumf>, %11, %cst_9 [1] : vector<8x16xf32> to vector<8xf32>
    %14 = vector.shape_cast %13 : vector<8xf32> to vector<8x1xf32>
    %15 = arith.maximumf %12, %14 : vector<8x1xf32>
    %16 = vector.broadcast %15 : vector<8x1xf32> to vector<8x16xf32>
    %17 = arith.subf %11, %16 : vector<8x16xf32>
    %18 = math.exp %17 : vector<8x16xf32>
    %c0_10 = arith.constant 0 : index
    %c0_11 = arith.constant 0 : index
    %19 = vector.load %arg12[%c0_10, %c0_11] : memref<8x1xf32, #tpu.memory_space<vmem>>, vector<8x1xf32>
    %20 = arith.subf %12, %15 : vector<8x1xf32>
    %21 = math.exp %20 : vector<8x1xf32>
    %22 = arith.mulf %19, %21 : vector<8x1xf32>
    %cst_12 = arith.constant dense<0.000000e+00> : vector<8xf32>
    %23 = vector.multi_reduction <add>, %18, %cst_12 [1] : vector<8x16xf32> to vector<8xf32>
    %24 = vector.shape_cast %23 : vector<8xf32> to vector<8x1xf32>
    %25 = arith.addf %22, %24 : vector<8x1xf32>
    %c0_13 = arith.constant 0 : index
    %c0_14 = arith.constant 0 : index
    %26 = vector.load %arg12[%c0_13, %c0_14] : memref<8x1xf32, #tpu.memory_space<vmem>>, vector<8x1xf32>
    tpu.vector_store %arg12[%c0_13, %c0_14], %25 {strides = array<i32>} : memref<8x1xf32, #tpu.memory_space<vmem>>, vector<8x1xf32>,
    %c0_15 = arith.constant 0 : index
    %c0_16 = arith.constant 0 : index
    %27 = vector.load %arg11[%c0_15, %c0_16] : memref<8x1xf32, #tpu.memory_space<vmem>>, vector<8x1xf32>
    tpu.vector_store %arg11[%c0_15, %c0_16], %15 {strides = array<i32>} : memref<8x1xf32, #tpu.memory_space<vmem>>, vector<8x1xf32>,
    %c0_i32_17 = arith.constant 0 : i32
    %28 = arith.cmpi eq, %arg2, %c0_i32_17 : i32
    %29 = arith.extui %28 : i1 to i32
    %c0_i32_18 = arith.constant 0 : i32
    %30 = arith.cmpi ne, %29, %c0_i32_18 : i32
    scf.if %30 {
      %c0_19 = arith.constant 0 : index
      %c0_20 = arith.constant 0 : index
      %31 = vector.load %arg12[%c0_19, %c0_20] : memref<8x1xf32, #tpu.memory_space<vmem>>, vector<8x1xf32>
      %32 = math.log %31 : vector<8x1xf32>
      %c0_21 = arith.constant 0 : index
      %c0_22 = arith.constant 0 : index
      %33 = vector.load %arg11[%c0_21, %c0_22] : memref<8x1xf32, #tpu.memory_space<vmem>>, vector<8x1xf32>
      %34 = arith.addf %32, %33 : vector<8x1xf32>
      %c0_23 = arith.constant 0 : index
      %c0_24 = arith.constant 0 : index
      %35 = vector.load %arg10[%c0_23, %c0_24] : memref<8x1xf32, #tpu.memory_space<vmem>>, vector<8x1xf32>
      %36 = arith.subf %34, %35 : vector<8x1xf32>
      %c0_25 = arith.constant 0 : index
      %c0_26 = arith.constant 0 : index
      %c0_27 = arith.constant 0 : index
      %37 = vector.load %arg8[%c0_25, %c0_26, %c0_27] : memref<1x8x1xf32, #tpu.memory_space<vmem>>, vector<1x8x1xf32>
      %38 = vector.shape_cast %37 : vector<1x8x1xf32> to vector<8x1xf32>
      %39 = vector.shape_cast %36 : vector<8x1xf32> to vector<1x8x1xf32>
      tpu.vector_store %arg8[%c0_25, %c0_26, %c0_27], %39 {strides = array<i32>} : memref<1x8x1xf32, #tpu.memory_space<vmem>>, vector<1x8x1xf32>,
    } else {
    }
    return
  }
  func.func @transform_0(%arg0: i32, %arg1: i32, %arg2: i32) -> i32 {
    %c0_i32 = arith.constant 0 : i32
    %c0_i32_0 = arith.constant 0 : i32
    return %c0_i32 : i32
  }
  func.func @transform_1(%arg0: i32, %arg1: i32, %arg2: i32) -> (i32, i32, i32) {
    %c0_i32 = arith.constant 0 : i32
    %c0_i32_0 = arith.constant 0 : i32
    return %arg0, %arg1, %c0_i32 : i32, i32, i32
  }
  func.func @transform_2(%arg0: i32, %arg1: i32, %arg2: i32) -> (i32, i32, i32) {
    %c1_i32 = arith.constant 1 : i32
    %0 = arith.subi %c1_i32, %arg0 : i32
    %c0_i32 = arith.constant 0 : i32
    %c0_i32_0 = arith.constant 0 : i32
    return %0, %arg1, %c0_i32 : i32, i32, i32
  }
  func.func @transform_3(%arg0: i32, %arg1: i32, %arg2: i32) -> (i32, i32, i32) {
    %c0_i32 = arith.constant 0 : i32
    %c0_i32_0 = arith.constant 0 : i32
    return %arg0, %c0_i32, %arg2 : i32, i32, i32
  }
  func.func @transform_4(%arg0: i32, %arg1: i32, %arg2: i32) -> (i32, i32) {
    %c0_i32 = arith.constant 0 : i32
    %c0_i32_0 = arith.constant 0 : i32
    %c0_i32_1 = arith.constant 0 : i32
    return %c0_i32, %c0_i32_0 : i32, i32
  }
  func.func @transform_5(%arg0: i32, %arg1: i32, %arg2: i32) -> (i32, i32, i32) {
    %c0_i32 = arith.constant 0 : i32
    %c0_i32_0 = arith.constant 0 : i32
    return %arg0, %arg1, %c0_i32 : i32, i32, i32
  }
}

</mosaic_0001>

<bundles_post_ra>
// kernel: infonce_forward.1
= control target key start
LH: loop header
LB: loop body
LE: loop exit
PB: predicated region body
PF: predicated region fallthrough
CT: control target
= control target key end

     0   :  { %s806_s20 = smov 0   ;;  %s808_s21 = smov 0   ;;  %s882_s0 = inlined_call_operand.<no memory space> [shape: f32[1], index: 0, kind: input, shape index: {}]   ;;  %s883_s1 = inlined_call_operand.vmem [shape: f32[2,8,32], index: 1, kind: input, shape index: {}, may-alias: {1,2}]   ;;  %s884_s2 = inlined_call_operand.vmem [shape: f32[2,8,32], index: 2, kind: input, shape index: {}, may-alias: {1,2}]   ;;  %s885_s3 = inlined_call_operand.vmem [shape: f32[2,32,16], index: 3, kind: input, shape index: {}]   ;;  %s886_s4 = inlined_call_operand.vmem [shape: f32[32,32], index: 4, kind: input, shape index: {}]   ;;  %s887_s5 = inlined_call_operand.vmem [shape: f32[2,8,1], index: 5, kind: output, shape index: {}]  }
   0x1   :  { %10 = sst [smem:[#allocation6]] %s882_s0  ;;  %s810_s22 = smov 0  }
   0x2 LB: > { %s35_s0 = sadd.s32 1, %s763_s21  ;;  %p658_p0 = scmp.ge.s32.totalorder %s767_s22, 1  ;;  %s767_s22 = sphi %s810_s22, %s16_s22   ;;  %s763_s21 = sphi %s808_s21, %s889_s21   ;;  %s759_s20 = sphi %s806_s20, %s888_s20  }
   0x3   : > { %p37_p1 = scmp.ge.s32.totalorder %s35_s0, 2  ;;  %p246_p2 = scmp.lt.s32.totalorder %s767_s22, 3 }
   0x5   : > { %s891_s0 = smov (%p37_p1, %s35_s0), 0  ;;  %p247_p3 = pnand %p658_p0, %p246_p2 }
   0x6   : > { %p294_p4 = scmp.lt.s32.totalorder (!%p247_p3), %s759_s20, 1  ;;  %s325_s15 = sld [smem:[#allocation6]] (!%p247_p3) }
   0x7   : > { %250 = sbr.rel (%p247_p3) target bundleno = 884 (0x374), region = 40  ;;  %s301_s16 = ssub.s32 (!%p247_p3), 1, %s759_s20 }
   0x8   : > { %p302_p5 = scmp.lt.s32.totalorder (!%p247_p3), %s301_s16, 1 }
   0xc   : > { %v337_v0 = vld [vmem:[%s886_s4 + $0x18] sm:$0xff]  ;;  %v769_v1 = vmov 0.0   ;;  %v336_v2 = vld [vmem:[%s886_s4 + $0x10] sm:$0xff]  ;;  %vm770_vm0 = vmmov 0   ;;  %s834_s27 = scalar_select %p294_p4, %s759_s20, 1  ;;  %v335_v3 = vld [vmem:[%s886_s4 + $0x8] sm:$0xff]  ;;  %v326_v10 = vstv %s325_s15 }
   0xd   : > { %679 = vmatprep.subr.mxu0 %v769_v1  ;;  %687 = vmatprep.mubr.msk.f32.mxu0 %vm770_vm0, %v769_v1  ;;  %v334_v4 = vld [vmem:[%s886_s4] sm:$0xff]  ;;  %vm338_vm1 = vcmask 261120   ;;  %733 = vrcp.f32 %v326_v10  ;;  %s893_s16 = smov (!%p302_p5, %s301_s16), 1  ;;  %vm421_vm2 = vcmask 7168   ;;  %vm508_vm3 = vcmask 130048  }
   0xe   : > { %680 = vmatpush3.msra.mxu0 %v337_v0  ;;  %690 = vmatprep.subr.mxu1 %v769_v1  ;;  %s659_s30 = sshll.u32 %s834_s27, 3  ;;  %s668_s11 = sshll.u32 %s834_s27, 5  ;;  %v771_v27 = vmov 0   ;;  %v772_v28 = vmov 1.0  }
   0xf   : > { %681 = vmatprep.subr.mxu0 %v769_v1  ;;  %698 = vmatprep.mubr.msk.f32.mxu1 %vm770_vm0, %v769_v1  ;;  %s300_s10 = scalar_lea.vmem %s883_s1, %s659_s30  ;;  %s317_s14 = scalar_lea.vmem %s885_s3, %s668_s11  ;;  %424 = vst.msk [vmem:[#allocation5] sm:$0xff] %vm421_vm2, %v772_v28 }
  0x10   : > { %682 = vmatpush3.msra.mxu0 %v336_v2  ;;  %v333_v5 = vld [vmem:[%s300_s10] sm:$0xff]  ;;  %v429_v6 = vld [vmem:[%s317_s14 + $0x18] sm:$0xff]  ;;  %v428_v7 = vld [vmem:[%s317_s14 + $0x10] sm:$0xff]  ;;  %s660_s17 = sshll.u32 %s893_s16, 3  ;;  %731 = vset.pattern.permute.xlu1 %v771_v27  ;;  %s324_s26 = scalar_lea.vmem %s887_s5, %s659_s30 }
  0x11   : > { %683 = vmatprep.subr.mxu0 %v769_v1  ;;  %691 = vmatpush3.msra.mxu1 %v429_v6  ;;  %v427_v8 = vld [vmem:[%s317_s14 + $0x8] sm:$0xff]  ;;  %v426_v9 = vld [vmem:[%s317_s14] sm:$0xff]  ;;  %s308_s23 = scalar_lea.vmem %s884_s2, %s660_s17 }
  0x12   : > { %684 = vmatpush3.msra.mxu0 %v335_v3  ;;  %692 = vmatprep.subr.mxu1 %v769_v1  ;;  %v412_v12 = vld [vmem:[%s308_s23] sm:$0xff] }
  0x13   : > { %685 = vmatprep.subr.mxu0 %v769_v1  ;;  %693 = vmatpush3.msra.mxu1 %v428_v7 }
  0x14   : > { %686 = vmatpush3.msra.mxu0 %v334_v4  ;;  %694 = vmatprep.subr.mxu1 %v769_v1 }
  0x15   : > { %688 = vmatmul.mubr.msk.f32.vlgmr.msra.gmra.mxu0 %vm338_vm1, %v333_v5  ;;  %695 = vmatpush3.msra.mxu1 %v427_v8 }
  0x16   : > { %696 = vmatprep.subr.mxu1 %v769_v1  ;;  %732 = vset.pattern.permute.xlu0 %v771_v27  ;;  %v521_v40 = vld [vmem:[#allocation5] sm:$0xff] }
  0x17   : > { %697 = vmatpush3.msra.mxu1 %v426_v9 }
  0x1a   : > { %v734_v11 = vpop.eup %733 }
  0x1b   : > { %701 = vpush %v734_v11 }
  0x4c   : > { %s702_s20 = spop %701 }
  0x4d   : > { %v418_v19 = vstv %s702_s20 }
  0xd5   : > { %v408_v13 = vpop.f32.mrf.mxu0 }
  0xd6   : > { %420 = vst.msk [vmem:[#allocation2] sm:$0xff] %vm338_vm1, %v408_v13  ;;  %v413_v14 = vmul.f32 %v412_v12, %v408_v13 }
  0xd7   : > { %v689_v15 = vpop.f32.mrf.mxu0 }
  0xd8   : > { %v414_v16 = vsel %vm338_vm1, %v413_v14, 0.0 }
  0xd9   : > { %415 = vadd.xlane.f32.xlu0 %v414_v16 }
  0xdd   : > { %v425_v17 = vld [vmem:[#allocation2] sm:$0xff] }
  0xde   : > { %699 = vmatmul.mubr.msk.f32.vlgmr.msra.gmra.mxu1 %vm338_vm1, %v425_v17 }
 0x162   : > { %v416_v18 = vpop.xlane.xlu0 %415 }
 0x163   : > { %735 = vtanh.f32 %v416_v18 }
 0x170   : > { %v736_v20 = vpop.eup %735 }
 0x171   : > { %v419_v21 = vmul.f32 %v736_v20, %v418_v19 }
 0x173   : > { %422 = vst.msk [vmem:[#allocation3] sm:$0xff] %vm421_vm2, %v419_v21  ;;  %423 = vst.msk [vmem:[#allocation4] sm:$0xff] %vm421_vm2, %v419_v21 }
 0x17a   : > { %v507_v29 = vld [vmem:[#allocation4] sm:$0xff]  ;;  %v541_v49 = vld [vmem:[#allocation3] sm:$0xff] }
 0x19e   : > { %v500_v22 = vpop.f32.mrf.mxu1 }
 0x19f   : > { %737 = vtanh.f32 %v500_v22 }
 0x1a0   : > { %v700_v23 = vpop.f32.mrf.mxu1 }
 0x1ac   : > { %v738_v24 = vpop.eup %737 }
 0x1ad   : > { %v506_v25 = vmul.f32 %v738_v24, %v418_v19 }
 0x1af   : > { %v509_v26 = vsel %vm508_vm3, %v506_v25, -inf }
 0x1b0   : > { %510 = vmax.xlane.f32.xlu0 %v509_v26 }
 0x239   : > { %v511_v30 = vpop.xlane.xlu0 %510 }
 0x23a   : > { %v512_v31 = vmax.f32 %v507_v29, %v511_v30 }
 0x23c   : > { %v522_v32 = vsub.f32 %v507_v29, %v512_v31  ;;  %532 = vst.msk [vmem:[#allocation4] sm:$0xff] %vm421_vm2, %v512_v31  ;;  %515 = vperm.xlu1 %731, %v512_v31  }
 0x23e   : > { %v523_v38 = vmul.f32 1.442695, %v522_v32 }
 0x243   : > { %v539_v47 = vld [vmem:[#allocation4] sm:$0xff] }
 0x2b7   : > { %v516_v33 = vpop.permute.xlu1 %515 }
 0x2b8   : > { %v518_v34 = vsub.f32 %v506_v25, %v516_v33 }
 0x2ba   : > { %v519_v35 = vmul.f32 1.442695, %v518_v34 }
 0x2bc   : > { %739 = vpow2.f32 %v519_v35 }
 0x2bd   : > { %741 = vpow2.f32 %v523_v38 }
 0x2c9   : > { %v740_v36 = vpop.eup %739 }
 0x2ca   : > { %v526_v37 = vsel %vm508_vm3, %v740_v36, 0.0  ;;  %v742_v39 = vpop.eup %741 }
 0x2cb   : > { %527 = vadd.xlane.f32.xlu1 %v526_v37  ;;  %v525_v41 = vmul.f32 %v742_v39, %v521_v40 }
 0x354   : > { %v528_v42 = vpop.xlane.xlu1 %527 }
 0x355   : > { %v529_v43 = vadd.f32 %v528_v42, %v525_v41 }
 0x357   : > { %531 = vst.msk [vmem:[#allocation5] sm:$0xff] %vm421_vm2, %v529_v43 }
 0x35e   : > { %v536_v44 = vld [vmem:[#allocation5] sm:$0xff] }
 0x35f   : > { %743 = vlog2.f32 %v536_v44 }
 0x36c   : > { %v744_v45 = vpop.eup %743 }
 0x36d   : > { %v538_v46 = vmul.f32 0.6931472, %v744_v45 }
 0x36f   : > { %v540_v48 = vadd.f32 %v539_v47, %v538_v46 }
 0x371   : > { %v542_v50 = vsub.f32 %v540_v48, %v541_v49 }
 0x373   : > { %543 = vst.msk [vmem:[%s324_s26] sm:$0xff] %vm421_vm2, %v542_v50 }
 0x374 PF: > { %s16_s22 = sadd.s32 1, %s767_s22   ;;  %s888_s20 = smov %s763_s21 }
 0x375   : > { %p13_p6 = scmp.ge.s32.totalorder %s16_s22, 4   ;;  %s889_s21 = smov %s891_s0 }
 0x377   :  { %15 = sbr.rel (!%p13_p6) target bundleno = 2 (0x2), region = 84 }

</bundles_post_ra>
